<compile_context>
chip_gen: v5e
topology: v5e:2x2
jax: 0.10.0
libtpu: 0.0.40
codegen_flags: <defaults>
</compile_context>

<pallas_src>
import functools
import math

import jax
import jax.numpy as jnp
from jax import lax
from jax.experimental import pallas as pl
from jax.experimental.pallas import tpu as pltpu


def _pick_tile(dim, target):
    """Largest tile <= target that is a multiple of 8 and divides dim (else full dim)."""
    if dim <= target:
        return dim
    t = (target // 8) * 8
    while t >= 8:
        if dim % t == 0:
            return t
        t -= 8
    return dim


def _qkv_proj_kernel(x_ref, w_ref, b_ref, q_ref, k_ref, v_ref):
    """Fused QKV projection: [q|k|v] = x @ W_qkv^T + b (weight pre-transposed, (E,3E))."""
    E = q_ref.shape[-1]
    qkv = jnp.dot(x_ref[...], w_ref[...], preferred_element_type=jnp.float32)
    qkv = qkv + b_ref[...].astype(jnp.float32)
    q_ref[...] = qkv[:, :E].astype(q_ref.dtype)
    k_ref[...] = qkv[:, E:2 * E].astype(k_ref.dtype)
    v_ref[...] = qkv[:, 2 * E:].astype(v_ref.dtype)


def _flash_attn_out_kernel(q_ref, k_ref, v_ref, wo_ref, bo_ref, o_ref,
                           m_sc, l_sc, acc_sc, *, num_heads, head_dim):
    """Online-softmax attention over kv tiles + fused output projection.

    Scratch (persistent across the kv grid axis, reset at kv==0):
      m_sc, l_sc : (H, TQ, 1) running max / running sum per head
      acc_sc     : (H, TQ, D) running (p @ v) accumulator per head
    The 1/sqrt(D) scale is already folded into the Q projection.
    """
    ki = pl.program_id(1)
    nk = pl.num_programs(1)
    D = head_dim

    @pl.when(ki == 0)
    def _init():
        m_sc[...] = jnp.full_like(m_sc, -jnp.inf)
        l_sc[...] = jnp.zeros_like(l_sc)
        acc_sc[...] = jnp.zeros_like(acc_sc)

    q = q_ref[...]            # (TQ, E), native dtype (scale pre-folded into weights)
    k = k_ref[...]            # (TK, E)
    v = v_ref[...]            # (TK, E)

    for h in range(num_heads):
        qh = q[:, h * D:(h + 1) * D]
        kh = k[:, h * D:(h + 1) * D]
        vh = v[:, h * D:(h + 1) * D]
        # q @ k^T without materializing a transpose: contract dim 1 of both operands.
        s = lax.dot_general(qh, kh, (((1,), (1,)), ((), ())),
                            preferred_element_type=jnp.float32)        # (TQ, TK) f32
        m_prev = m_sc[h]
        l_prev = l_sc[h]
        m_new = jnp.maximum(m_prev, s.max(axis=-1, keepdims=True))
        alpha = jnp.exp(m_prev - m_new)
        p = jnp.exp(s - m_new)
        l_sc[h] = alpha * l_prev + p.sum(axis=-1, keepdims=True)
        acc_sc[h] = alpha * acc_sc[h] + jnp.dot(
            p.astype(vh.dtype), vh, preferred_element_type=jnp.float32)
        m_sc[h] = m_new

    @pl.when(ki == nk - 1)
    def _finalize():
        wo = wo_ref[...]                                # (E, E) = W_o^T
        out = bo_ref[...].astype(jnp.float32)           # (1, E); broadcasts below
        for h in range(num_heads):
            # Normalize and fold this head's context directly into the out-projection.
            ctx_h = acc_sc[h] * pl.reciprocal(l_sc[h], approx=True)    # (TQ, D)
            out = out + jnp.dot(ctx_h.astype(wo.dtype),
                                wo[h * D:(h + 1) * D, :],
                                preferred_element_type=jnp.float32)
        o_ref[...] = out.astype(o_ref.dtype)


def prepare_attention_params(params, num_heads):
    """One-time weight re-layout (hoisted out of the per-call hot path)."""
    E = params["out_proj_weight"].shape[0]
    D = E // num_heads
    scale = 1.0 / math.sqrt(D)
    w = params["in_proj_weight"]       # (3E, E)
    b = params["in_proj_bias"]         # (3E,)
    # Pre-transpose and fuse so the kernel computes x @ W_qkv; fold 1/sqrt(D) into Q.
    w_qkv = jnp.concatenate([w[:E].T * scale, w[E:2 * E].T, w[2 * E:].T], axis=1)
    b_qkv = jnp.concatenate([b[:E] * scale, b[E:2 * E], b[2 * E:]]).reshape(1, 3 * E)
    return {
        "w_qkv_t": w_qkv,                               # (E, 3E)
        "b_qkv": b_qkv,                                 # (1, 3E)
        "wo_t": params["out_proj_weight"].T,            # (E, E)
        "bo": params["out_proj_bias"].reshape(1, E),    # (1, E)
    }


@functools.partial(jax.jit, static_argnames=("num_heads",))
def self_attention_layer(x, prepared, *, num_heads):
    """Equivalent of SelfAttentionLayer.forward for a single (S, E) input."""
    S, E = x.shape
    assert E % num_heads == 0
    D = E // num_heads

    vmem_limit = 32 * 1024 * 1024
    ts = _pick_tile(S, 256)

    # ---- Kernel 1: fused QKV projection, tiled over S ("parallel"). ----
    q, k, v = pl.pallas_call(
        _qkv_proj_kernel,
        out_shape=tuple(jax.ShapeDtypeStruct((S, E), x.dtype) for _ in range(3)),
        grid_spec=pltpu.PrefetchScalarGridSpec(
            num_scalar_prefetch=0,
            grid=(S // ts,),
            in_specs=[
                pl.BlockSpec((ts, E), lambda i: (i, 0)),        # x tile
                pl.BlockSpec((E, 3 * E), lambda i: (0, 0)),     # W_qkv^T (resident)
                pl.BlockSpec((1, 3 * E), lambda i: (0, 0)),     # b_qkv  (resident)
            ],
            out_specs=(
                pl.BlockSpec((ts, E), lambda i: (i, 0)),
                pl.BlockSpec((ts, E), lambda i: (i, 0)),
                pl.BlockSpec((ts, E), lambda i: (i, 0)),
            ),
        ),
        compiler_params=pltpu.CompilerParams(
            dimension_semantics=("parallel",),
            vmem_limit_bytes=vmem_limit),
    )(x, prepared["w_qkv_t"], prepared["b_qkv"])

    # ---- Kernel 2: flash attention + output projection. ----
    tq = _pick_tile(S, 256)
    tk = _pick_tile(S, 256)
    kernel = functools.partial(_flash_attn_out_kernel,
                               num_heads=num_heads, head_dim=D)
    out = pl.pallas_call(
        kernel,
        out_shape=jax.ShapeDtypeStruct((S, E), x.dtype),
        grid_spec=pltpu.PrefetchScalarGridSpec(
            num_scalar_prefetch=0,
            grid=(S // tq, S // tk),            # kv (reduction) axis innermost
            in_specs=[
                pl.BlockSpec((tq, E), lambda qi, ki: (qi, 0)),   # q tile
                pl.BlockSpec((tk, E), lambda qi, ki: (ki, 0)),   # k tile
                pl.BlockSpec((tk, E), lambda qi, ki: (ki, 0)),   # v tile
                pl.BlockSpec((E, E), lambda qi, ki: (0, 0)),     # W_o^T (resident)
                pl.BlockSpec((1, E), lambda qi, ki: (0, 0)),     # b_o   (resident)
            ],
            out_specs=pl.BlockSpec((tq, E), lambda qi, ki: (qi, 0)),
            scratch_shapes=[
                pltpu.VMEM((num_heads, tq, 1), jnp.float32),     # running max
                pltpu.VMEM((num_heads, tq, 1), jnp.float32),     # running sum
                pltpu.VMEM((num_heads, tq, D), jnp.float32),     # running p @ v
            ],
        ),
        compiler_params=pltpu.CompilerParams(
            dimension_semantics=("parallel", "arbitrary"),
            vmem_limit_bytes=vmem_limit),
    )(q, k, v, prepared["wo_t"], prepared["bo"])
    return out


def _reference_mha(x, params, num_heads):
    """Pure-JAX reference matching torch.nn.MultiheadAttention (batch=1)."""
    S, E = x.shape
    D = E // num_heads
    w = params["in_proj_weight"]
    b = params["in_proj_bias"]
    q = x @ w[:E].T + b[:E]
    k = x @ w[E:2 * E].T + b[E:2 * E]
    v = x @ w[2 * E:].T + b[2 * E:]
    q = q.reshape(S, num_heads, D).transpose(1, 0, 2)
    k = k.reshape(S, num_heads, D).transpose(1, 0, 2)
    v = v.reshape(S, num_heads, D).transpose(1, 0, 2)
    s = jnp.einsum("hqd,hkd->hqk", q, k) / math.sqrt(D)
    p = jax.nn.softmax(s, axis=-1)
    ctx = jnp.einsum("hqk,hkd->hqd", p, v).transpose(1, 0, 2).reshape(S, E)
    return ctx @ params["out_proj_weight"].T + params["out_proj_bias"]


if __name__ == "__main__":
    embed_dim = 32
    num_heads = 4
    seq = 8

    key = jax.random.PRNGKey(0)
    k_x, k_w, k_b, k_ow, k_ob = jax.random.split(key, 5)

    bound = 1.0 / math.sqrt(embed_dim)
    params = {
        "in_proj_weight": jax.random.uniform(
            k_w, (3 * embed_dim, embed_dim), jnp.float32, -bound, bound),
        "in_proj_bias": jax.random.uniform(
            k_b, (3 * embed_dim,), jnp.float32, -bound, bound),
        "out_proj_weight": jax.random.uniform(
            k_ow, (embed_dim, embed_dim), jnp.float32, -bound, bound),
        "out_proj_bias": jax.random.uniform(
            k_ob, (embed_dim,), jnp.float32, -bound, bound),
    }

    x = jax.random.normal(k_x, (seq, embed_dim), jnp.float32)

    prepared = prepare_attention_params(params, num_heads)   # one-time weight prep
    out = self_attention_layer(x, prepared, num_heads=num_heads)
    out = jax.block_until_ready(out)

    ref = _reference_mha(x, params, num_heads)
    assert out.shape == (seq, embed_dim)
    # approx=True reciprocal in the softmax denominator -> allow small drift vs f32 ref.
    assert jnp.allclose(out, ref, atol=2e-3, rtol=2e-3), float(jnp.max(jnp.abs(out - ref)))

    print("KERNEL_OK")
</pallas_src>

<mosaic_0001>
module attributes {stable_mosaic.version = 11 : i64} {
  func.func @_qkv_proj_kernel(%arg0: i32, %arg1: memref<8x32xf32, #tpu.memory_space<vmem>>, %arg2: memref<32x96xf32, #tpu.memory_space<vmem>>, %arg3: memref<1x96xf32, #tpu.memory_space<vmem>>, %arg4: memref<8x32xf32, #tpu.memory_space<vmem>>, %arg5: memref<8x32xf32, #tpu.memory_space<vmem>>, %arg6: memref<8x32xf32, #tpu.memory_space<vmem>>) attributes {dimension_semantics = [#tpu.dimension_semantics<parallel>], iteration_bounds = array<i64: 1>, scalar_prefetch = 0 : i64, scratch_operands = 0 : i64, tpu.core_type = #tpu.core_type<tc>, window_params = [{transform_indices = @transform_0, window_bounds = array<i64: 8, 32>}, {pipeline_mode = #tpu.pipeline_mode<synchronous>, transform_indices = @transform_1, window_bounds = array<i64: 32, 96>}, {pipeline_mode = #tpu.pipeline_mode<synchronous>, transform_indices = @transform_2, window_bounds = array<i64: 1, 96>}, {transform_indices = @transform_3, window_bounds = array<i64: 8, 32>}, {transform_indices = @transform_4, window_bounds = array<i64: 8, 32>}, {transform_indices = @transform_5, window_bounds = array<i64: 8, 32>}]} {
    %c0 = arith.constant 0 : index
    %c0_0 = arith.constant 0 : index
    %0 = vector.load %arg1[%c0, %c0_0] : memref<8x32xf32, #tpu.memory_space<vmem>>, vector<8x32xf32>
    %c0_1 = arith.constant 0 : index
    %c0_2 = arith.constant 0 : index
    %1 = vector.load %arg2[%c0_1, %c0_2] : memref<32x96xf32, #tpu.memory_space<vmem>>, vector<32x96xf32>
    %cst = arith.constant dense<0.000000e+00> : vector<8x96xf32>
    %2 = tpu.matmul %0, %1, %cst {dimension_numbers = #tpu.dot_dimension_numbers<[1], [0], [0], [1], [0, 0, 1, 1], [], []>} : vector<8x32xf32>, vector<32x96xf32>, vector<8x96xf32> -> vector<8x96xf32>
    %c0_3 = arith.constant 0 : index
    %c0_4 = arith.constant 0 : index
    %3 = vector.load %arg3[%c0_3, %c0_4] : memref<1x96xf32, #tpu.memory_space<vmem>>, vector<1x96xf32>
    %4 = vector.broadcast %3 : vector<1x96xf32> to vector<8x96xf32>
    %5 = arith.addf %2, %4 : vector<8x96xf32>
    %6 = vector.extract_strided_slice %5 {offsets = [0, 0], sizes = [8, 32], strides = [1, 1]} : vector<8x96xf32> to vector<8x32xf32>
    %c0_5 = arith.constant 0 : index
    %c0_6 = arith.constant 0 : index
    %7 = vector.load %arg4[%c0_5, %c0_6] : memref<8x32xf32, #tpu.memory_space<vmem>>, vector<8x32xf32>
    tpu.vector_store %arg4[%c0_5, %c0_6], %6 {strides = array<i32>} : memref<8x32xf32, #tpu.memory_space<vmem>>, vector<8x32xf32>,
    %8 = vector.extract_strided_slice %5 {offsets = [0, 32], sizes = [8, 32], strides = [1, 1]} : vector<8x96xf32> to vector<8x32xf32>
    %c0_7 = arith.constant 0 : index
    %c0_8 = arith.constant 0 : index
    %9 = vector.load %arg5[%c0_7, %c0_8] : memref<8x32xf32, #tpu.memory_space<vmem>>, vector<8x32xf32>
    tpu.vector_store %arg5[%c0_7, %c0_8], %8 {strides = array<i32>} : memref<8x32xf32, #tpu.memory_space<vmem>>, vector<8x32xf32>,
    %10 = vector.extract_strided_slice %5 {offsets = [0, 64], sizes = [8, 32], strides = [1, 1]} : vector<8x96xf32> to vector<8x32xf32>
    %c0_9 = arith.constant 0 : index
    %c0_10 = arith.constant 0 : index
    %11 = vector.load %arg6[%c0_9, %c0_10] : memref<8x32xf32, #tpu.memory_space<vmem>>, vector<8x32xf32>
    tpu.vector_store %arg6[%c0_9, %c0_10], %10 {strides = array<i32>} : memref<8x32xf32, #tpu.memory_space<vmem>>, vector<8x32xf32>,
    return
  }
  func.func @transform_0(%arg0: i32) -> (i32, i32) {
    %c0_i32 = arith.constant 0 : i32
    %c0_i32_0 = arith.constant 0 : i32
    return %arg0, %c0_i32 : i32, i32
  }
  func.func @transform_1(%arg0: i32) -> (i32, i32) {
    %c0_i32 = arith.constant 0 : i32
    %c0_i32_0 = arith.constant 0 : i32
    %c0_i32_1 = arith.constant 0 : i32
    return %c0_i32, %c0_i32_0 : i32, i32
  }
  func.func @transform_2(%arg0: i32) -> (i32, i32) {
    %c0_i32 = arith.constant 0 : i32
    %c0_i32_0 = arith.constant 0 : i32
    %c0_i32_1 = arith.constant 0 : i32
    return %c0_i32, %c0_i32_0 : i32, i32
  }
  func.func @transform_3(%arg0: i32) -> (i32, i32) {
    %c0_i32 = arith.constant 0 : i32
    %c0_i32_0 = arith.constant 0 : i32
    return %arg0, %c0_i32 : i32, i32
  }
  func.func @transform_4(%arg0: i32) -> (i32, i32) {
    %c0_i32 = arith.constant 0 : i32
    %c0_i32_0 = arith.constant 0 : i32
    return %arg0, %c0_i32 : i32, i32
  }
  func.func @transform_5(%arg0: i32) -> (i32, i32) {
    %c0_i32 = arith.constant 0 : i32
    %c0_i32_0 = arith.constant 0 : i32
    return %arg0, %c0_i32 : i32, i32
  }
}

module attributes {stable_mosaic.version = 11 : i64} {
  func.func @_flash_attn_out_kernel(%arg0: i32, %arg1: i32, %arg2: memref<8x32xf32, #tpu.memory_space<vmem>>, %arg3: memref<8x32xf32, #tpu.memory_space<vmem>>, %arg4: memref<8x32xf32, #tpu.memory_space<vmem>>, %arg5: memref<32x32xf32, #tpu.memory_space<vmem>>, %arg6: memref<1x32xf32, #tpu.memory_space<vmem>>, %arg7: memref<8x32xf32, #tpu.memory_space<vmem>>, %arg8: memref<4x8x1xf32, #tpu.memory_space<vmem>>, %arg9: memref<4x8x1xf32, #tpu.memory_space<vmem>>, %arg10: memref<4x8x8xf32, #tpu.memory_space<vmem>>) attributes {dimension_semantics = [#tpu.dimension_semantics<parallel>, #tpu.dimension_semantics<arbitrary>], iteration_bounds = array<i64: 1, 1>, scalar_prefetch = 0 : i64, scratch_operands = 3 : i64, tpu.core_type = #tpu.core_type<tc>, window_params = [{transform_indices = @transform_0, window_bounds = array<i64: 8, 32>}, {transform_indices = @transform_1, window_bounds = array<i64: 8, 32>}, {transform_indices = @transform_2, window_bounds = array<i64: 8, 32>}, {pipeline_mode = #tpu.pipeline_mode<synchronous>, transform_indices = @transform_3, window_bounds = array<i64: 32, 32>}, {pipeline_mode = #tpu.pipeline_mode<synchronous>, transform_indices = @transform_4, window_bounds = array<i64: 1, 32>}, {transform_indices = @transform_5, window_bounds = array<i64: 8, 32>}]} {
    %c0_i32 = arith.constant 0 : i32
    %0 = arith.cmpi eq, %arg1, %c0_i32 : i32
    %1 = arith.extui %0 : i1 to i32
    %c0_i32_0 = arith.constant 0 : i32
    %2 = arith.cmpi ne, %1, %c0_i32_0 : i32
    scf.if %2 {
      %cst_92 = arith.constant 0xFF800000 : f32
      %149 = vector.broadcast %cst_92 : f32 to vector<4x8x1xf32>
      %c0_93 = arith.constant 0 : index
      %c0_94 = arith.constant 0 : index
      %c0_95 = arith.constant 0 : index
      %150 = vector.load %arg8[%c0_93, %c0_94, %c0_95] : memref<4x8x1xf32, #tpu.memory_space<vmem>>, vector<4x8x1xf32>
      tpu.vector_store %arg8[%c0_93, %c0_94, %c0_95], %149 {strides = array<i32>} : memref<4x8x1xf32, #tpu.memory_space<vmem>>, vector<4x8x1xf32>,
      %cst_96 = arith.constant 0.000000e+00 : f32
      %151 = vector.broadcast %cst_96 : f32 to vector<4x8x1xf32>
      %c0_97 = arith.constant 0 : index
      %c0_98 = arith.constant 0 : index
      %c0_99 = arith.constant 0 : index
      %152 = vector.load %arg9[%c0_97, %c0_98, %c0_99] : memref<4x8x1xf32, #tpu.memory_space<vmem>>, vector<4x8x1xf32>
      tpu.vector_store %arg9[%c0_97, %c0_98, %c0_99], %151 {strides = array<i32>} : memref<4x8x1xf32, #tpu.memory_space<vmem>>, vector<4x8x1xf32>,
      %cst_100 = arith.constant 0.000000e+00 : f32
      %153 = vector.broadcast %cst_100 : f32 to vector<4x8x8xf32>
      %c0_101 = arith.constant 0 : index
      %c0_102 = arith.constant 0 : index
      %c0_103 = arith.constant 0 : index
      %154 = vector.load %arg10[%c0_101, %c0_102, %c0_103] : memref<4x8x8xf32, #tpu.memory_space<vmem>>, vector<4x8x8xf32>
      tpu.vector_store %arg10[%c0_101, %c0_102, %c0_103], %153 {strides = array<i32>} : memref<4x8x8xf32, #tpu.memory_space<vmem>>, vector<4x8x8xf32>,
    } else {
    }
    %c0 = arith.constant 0 : index
    %c0_1 = arith.constant 0 : index
    %3 = vector.load %arg2[%c0, %c0_1] : memref<8x32xf32, #tpu.memory_space<vmem>>, vector<8x32xf32>
    %c0_2 = arith.constant 0 : index
    %c0_3 = arith.constant 0 : index
    %4 = vector.load %arg3[%c0_2, %c0_3] : memref<8x32xf32, #tpu.memory_space<vmem>>, vector<8x32xf32>
    %c0_4 = arith.constant 0 : index
    %c0_5 = arith.constant 0 : index
    %5 = vector.load %arg4[%c0_4, %c0_5] : memref<8x32xf32, #tpu.memory_space<vmem>>, vector<8x32xf32>
    %6 = vector.extract_strided_slice %3 {offsets = [0, 0], sizes = [8, 8], strides = [1, 1]} : vector<8x32xf32> to vector<8x8xf32>
    %7 = vector.extract_strided_slice %4 {offsets = [0, 0], sizes = [8, 8], strides = [1, 1]} : vector<8x32xf32> to vector<8x8xf32>
    %8 = vector.extract_strided_slice %5 {offsets = [0, 0], sizes = [8, 8], strides = [1, 1]} : vector<8x32xf32> to vector<8x8xf32>
    %cst = arith.constant dense<0.000000e+00> : vector<8x8xf32>
    %9 = tpu.matmul %6, %7, %cst {dimension_numbers = #tpu.dot_dimension_numbers<[1], [1], [0], [0], [0, 0, 1, 0], [], []>} : vector<8x8xf32>, vector<8x8xf32>, vector<8x8xf32> -> vector<8x8xf32>
    %c0_6 = arith.constant 0 : index
    %c0_7 = arith.constant 0 : index
    %c0_8 = arith.constant 0 : index
    %10 = vector.load %arg8[%c0_6, %c0_7, %c0_8] : memref<4x8x1xf32, #tpu.memory_space<vmem>>, vector<1x8x1xf32>
    %11 = vector.shape_cast %10 : vector<1x8x1xf32> to vector<8x1xf32>
    %c0_9 = arith.constant 0 : index
    %c0_10 = arith.constant 0 : index
    %c0_11 = arith.constant 0 : index
    %12 = vector.load %arg9[%c0_9, %c0_10, %c0_11] : memref<4x8x1xf32, #tpu.memory_space<vmem>>, vector<1x8x1xf32>
    %13 = vector.shape_cast %12 : vector<1x8x1xf32> to vector<8x1xf32>
    %cst_12 = arith.constant dense<0xFF800000> : vector<8xf32>
    %14 = vector.multi_reduction <maximumf>, %9, %cst_12 [1] : vector<8x8xf32> to vector<8xf32>
    %15 = vector.shape_cast %14 : vector<8xf32> to vector<8x1xf32>
    %16 = arith.maximumf %11, %15 : vector<8x1xf32>
    %17 = arith.subf %11, %16 : vector<8x1xf32>
    %18 = math.exp %17 : vector<8x1xf32>
    %19 = vector.broadcast %16 : vector<8x1xf32> to vector<8x8xf32>
    %20 = arith.subf %9, %19 : vector<8x8xf32>
    %21 = math.exp %20 : vector<8x8xf32>
    %22 = arith.mulf %18, %13 : vector<8x1xf32>
    %cst_13 = arith.constant dense<0.000000e+00> : vector<8xf32>
    %23 = vector.multi_reduction <add>, %21, %cst_13 [1] : vector<8x8xf32> to vector<8xf32>
    %24 = vector.shape_cast %23 : vector<8xf32> to vector<8x1xf32>
    %25 = arith.addf %22, %24 : vector<8x1xf32>
    %c0_14 = arith.constant 0 : index
    %c0_15 = arith.constant 0 : index
    %c0_16 = arith.constant 0 : index
    %26 = vector.load %arg9[%c0_14, %c0_15, %c0_16] : memref<4x8x1xf32, #tpu.memory_space<vmem>>, vector<1x8x1xf32>
    %27 = vector.shape_cast %26 : vector<1x8x1xf32> to vector<8x1xf32>
    %28 = vector.shape_cast %25 : vector<8x1xf32> to vector<1x8x1xf32>
    tpu.vector_store %arg9[%c0_14, %c0_15, %c0_16], %28 {strides = array<i32>} : memref<4x8x1xf32, #tpu.memory_space<vmem>>, vector<1x8x1xf32>,
    %c0_17 = arith.constant 0 : index
    %c0_18 = arith.constant 0 : index
    %c0_19 = arith.constant 0 : index
    %29 = vector.load %arg10[%c0_17, %c0_18, %c0_19] : memref<4x8x8xf32, #tpu.memory_space<vmem>>, vector<1x8x8xf32>
    %30 = vector.shape_cast %29 : vector<1x8x8xf32> to vector<8x8xf32>
    %31 = vector.broadcast %18 : vector<8x1xf32> to vector<8x8xf32>
    %32 = arith.mulf %31, %30 : vector<8x8xf32>
    %cst_20 = arith.constant dense<0.000000e+00> : vector<8x8xf32>
    %33 = tpu.matmul %21, %8, %cst_20 {dimension_numbers = #tpu.dot_dimension_numbers<[1], [0], [0], [1], [0, 0, 1, 1], [], []>} : vector<8x8xf32>, vector<8x8xf32>, vector<8x8xf32> -> vector<8x8xf32>
    %34 = arith.addf %32, %33 : vector<8x8xf32>
    %c0_21 = arith.constant 0 : index
    %c0_22 = arith.constant 0 : index
    %c0_23 = arith.constant 0 : index
    %35 = vector.load %arg10[%c0_21, %c0_22, %c0_23] : memref<4x8x8xf32, #tpu.memory_space<vmem>>, vector<1x8x8xf32>
    %36 = vector.shape_cast %35 : vector<1x8x8xf32> to vector<8x8xf32>
    %37 = vector.shape_cast %34 : vector<8x8xf32> to vector<1x8x8xf32>
    tpu.vector_store %arg10[%c0_21, %c0_22, %c0_23], %37 {strides = array<i32>} : memref<4x8x8xf32, #tpu.memory_space<vmem>>, vector<1x8x8xf32>,
    %c0_24 = arith.constant 0 : index
    %c0_25 = arith.constant 0 : index
    %c0_26 = arith.constant 0 : index
    %38 = vector.load %arg8[%c0_24, %c0_25, %c0_26] : memref<4x8x1xf32, #tpu.memory_space<vmem>>, vector<1x8x1xf32>
    %39 = vector.shape_cast %38 : vector<1x8x1xf32> to vector<8x1xf32>
    %40 = vector.shape_cast %16 : vector<8x1xf32> to vector<1x8x1xf32>
    tpu.vector_store %arg8[%c0_24, %c0_25, %c0_26], %40 {strides = array<i32>} : memref<4x8x1xf32, #tpu.memory_space<vmem>>, vector<1x8x1xf32>,
    %41 = vector.extract_strided_slice %3 {offsets = [0, 8], sizes = [8, 8], strides = [1, 1]} : vector<8x32xf32> to vector<8x8xf32>
    %42 = vector.extract_strided_slice %4 {offsets = [0, 8], sizes = [8, 8], strides = [1, 1]} : vector<8x32xf32> to vector<8x8xf32>
    %43 = vector.extract_strided_slice %5 {offsets = [0, 8], sizes = [8, 8], strides = [1, 1]} : vector<8x32xf32> to vector<8x8xf32>
    %cst_27 = arith.constant dense<0.000000e+00> : vector<8x8xf32>
    %44 = tpu.matmul %41, %42, %cst_27 {dimension_numbers = #tpu.dot_dimension_numbers<[1], [1], [0], [0], [0, 0, 1, 0], [], []>} : vector<8x8xf32>, vector<8x8xf32>, vector<8x8xf32> -> vector<8x8xf32>
    %c1 = arith.constant 1 : index
    %c0_28 = arith.constant 0 : index
    %c0_29 = arith.constant 0 : index
    %45 = vector.load %arg8[%c1, %c0_28, %c0_29] : memref<4x8x1xf32, #tpu.memory_space<vmem>>, vector<1x8x1xf32>
    %46 = vector.shape_cast %45 : vector<1x8x1xf32> to vector<8x1xf32>
    %c1_30 = arith.constant 1 : index
    %c0_31 = arith.constant 0 : index
    %c0_32 = arith.constant 0 : index
    %47 = vector.load %arg9[%c1_30, %c0_31, %c0_32] : memref<4x8x1xf32, #tpu.memory_space<vmem>>, vector<1x8x1xf32>
    %48 = vector.shape_cast %47 : vector<1x8x1xf32> to vector<8x1xf32>
    %cst_33 = arith.constant dense<0xFF800000> : vector<8xf32>
    %49 = vector.multi_reduction <maximumf>, %44, %cst_33 [1] : vector<8x8xf32> to vector<8xf32>
    %50 = vector.shape_cast %49 : vector<8xf32> to vector<8x1xf32>
    %51 = arith.maximumf %46, %50 : vector<8x1xf32>
    %52 = arith.subf %46, %51 : vector<8x1xf32>
    %53 = math.exp %52 : vector<8x1xf32>
    %54 = vector.broadcast %51 : vector<8x1xf32> to vector<8x8xf32>
    %55 = arith.subf %44, %54 : vector<8x8xf32>
    %56 = math.exp %55 : vector<8x8xf32>
    %57 = arith.mulf %53, %48 : vector<8x1xf32>
    %cst_34 = arith.constant dense<0.000000e+00> : vector<8xf32>
    %58 = vector.multi_reduction <add>, %56, %cst_34 [1] : vector<8x8xf32> to vector<8xf32>
    %59 = vector.shape_cast %58 : vector<8xf32> to vector<8x1xf32>
    %60 = arith.addf %57, %59 : vector<8x1xf32>
    %c1_35 = arith.constant 1 : index
    %c0_36 = arith.constant 0 : index
    %c0_37 = arith.constant 0 : index
    %61 = vector.load %arg9[%c1_35, %c0_36, %c0_37] : memref<4x8x1xf32, #tpu.memory_space<vmem>>, vector<1x8x1xf32>
    %62 = vector.shape_cast %61 : vector<1x8x1xf32> to vector<8x1xf32>
    %63 = vector.shape_cast %60 : vector<8x1xf32> to vector<1x8x1xf32>
    tpu.vector_store %arg9[%c1_35, %c0_36, %c0_37], %63 {strides = array<i32>} : memref<4x8x1xf32, #tpu.memory_space<vmem>>, vector<1x8x1xf32>,
    %c1_38 = arith.constant 1 : index
    %c0_39 = arith.constant 0 : index
    %c0_40 = arith.constant 0 : index
    %64 = vector.load %arg10[%c1_38, %c0_39, %c0_40] : memref<4x8x8xf32, #tpu.memory_space<vmem>>, vector<1x8x8xf32>
    %65 = vector.shape_cast %64 : vector<1x8x8xf32> to vector<8x8xf32>
    %66 = vector.broadcast %53 : vector<8x1xf32> to vector<8x8xf32>
    %67 = arith.mulf %66, %65 : vector<8x8xf32>
    %cst_41 = arith.constant dense<0.000000e+00> : vector<8x8xf32>
    %68 = tpu.matmul %56, %43, %cst_41 {dimension_numbers = #tpu.dot_dimension_numbers<[1], [0], [0], [1], [0, 0, 1, 1], [], []>} : vector<8x8xf32>, vector<8x8xf32>, vector<8x8xf32> -> vector<8x8xf32>
    %69 = arith.addf %67, %68 : vector<8x8xf32>
    %c1_42 = arith.constant 1 : index
    %c0_43 = arith.constant 0 : index
    %c0_44 = arith.constant 0 : index
    %70 = vector.load %arg10[%c1_42, %c0_43, %c0_44] : memref<4x8x8xf32, #tpu.memory_space<vmem>>, vector<1x8x8xf32>
    %71 = vector.shape_cast %70 : vector<1x8x8xf32> to vector<8x8xf32>
    %72 = vector.shape_cast %69 : vector<8x8xf32> to vector<1x8x8xf32>
    tpu.vector_store %arg10[%c1_42, %c0_43, %c0_44], %72 {strides = array<i32>} : memref<4x8x8xf32, #tpu.memory_space<vmem>>, vector<1x8x8xf32>,
    %c1_45 = arith.constant 1 : index
    %c0_46 = arith.constant 0 : index
    %c0_47 = arith.constant 0 : index
    %73 = vector.load %arg8[%c1_45, %c0_46, %c0_47] : memref<4x8x1xf32, #tpu.memory_space<vmem>>, vector<1x8x1xf32>
    %74 = vector.shape_cast %73 : vector<1x8x1xf32> to vector<8x1xf32>
    %75 = vector.shape_cast %51 : vector<8x1xf32> to vector<1x8x1xf32>
    tpu.vector_store %arg8[%c1_45, %c0_46, %c0_47], %75 {strides = array<i32>} : memref<4x8x1xf32, #tpu.memory_space<vmem>>, vector<1x8x1xf32>,
    %76 = vector.extract_strided_slice %3 {offsets = [0, 16], sizes = [8, 8], strides = [1, 1]} : vector<8x32xf32> to vector<8x8xf32>
    %77 = vector.extract_strided_slice %4 {offsets = [0, 16], sizes = [8, 8], strides = [1, 1]} : vector<8x32xf32> to vector<8x8xf32>
    %78 = vector.extract_strided_slice %5 {offsets = [0, 16], sizes = [8, 8], strides = [1, 1]} : vector<8x32xf32> to vector<8x8xf32>
    %cst_48 = arith.constant dense<0.000000e+00> : vector<8x8xf32>
    %79 = tpu.matmul %76, %77, %cst_48 {dimension_numbers = #tpu.dot_dimension_numbers<[1], [1], [0], [0], [0, 0, 1, 0], [], []>} : vector<8x8xf32>, vector<8x8xf32>, vector<8x8xf32> -> vector<8x8xf32>
    %c2 = arith.constant 2 : index
    %c0_49 = arith.constant 0 : index
    %c0_50 = arith.constant 0 : index
    %80 = vector.load %arg8[%c2, %c0_49, %c0_50] : memref<4x8x1xf32, #tpu.memory_space<vmem>>, vector<1x8x1xf32>
    %81 = vector.shape_cast %80 : vector<1x8x1xf32> to vector<8x1xf32>
    %c2_51 = arith.constant 2 : index
    %c0_52 = arith.constant 0 : index
    %c0_53 = arith.constant 0 : index
    %82 = vector.load %arg9[%c2_51, %c0_52, %c0_53] : memref<4x8x1xf32, #tpu.memory_space<vmem>>, vector<1x8x1xf32>
    %83 = vector.shape_cast %82 : vector<1x8x1xf32> to vector<8x1xf32>
    %cst_54 = arith.constant dense<0xFF800000> : vector<8xf32>
    %84 = vector.multi_reduction <maximumf>, %79, %cst_54 [1] : vector<8x8xf32> to vector<8xf32>
    %85 = vector.shape_cast %84 : vector<8xf32> to vector<8x1xf32>
    %86 = arith.maximumf %81, %85 : vector<8x1xf32>
    %87 = arith.subf %81, %86 : vector<8x1xf32>
    %88 = math.exp %87 : vector<8x1xf32>
    %89 = vector.broadcast %86 : vector<8x1xf32> to vector<8x8xf32>
    %90 = arith.subf %79, %89 : vector<8x8xf32>
    %91 = math.exp %90 : vector<8x8xf32>
    %92 = arith.mulf %88, %83 : vector<8x1xf32>
    %cst_55 = arith.constant dense<0.000000e+00> : vector<8xf32>
    %93 = vector.multi_reduction <add>, %91, %cst_55 [1] : vector<8x8xf32> to vector<8xf32>
    %94 = vector.shape_cast %93 : vector<8xf32> to vector<8x1xf32>
    %95 = arith.addf %92, %94 : vector<8x1xf32>
    %c2_56 = arith.constant 2 : index
    %c0_57 = arith.constant 0 : index
    %c0_58 = arith.constant 0 : index
    %96 = vector.load %arg9[%c2_56, %c0_57, %c0_58] : memref<4x8x1xf32, #tpu.memory_space<vmem>>, vector<1x8x1xf32>
    %97 = vector.shape_cast %96 : vector<1x8x1xf32> to vector<8x1xf32>
    %98 = vector.shape_cast %95 : vector<8x1xf32> to vector<1x8x1xf32>
    tpu.vector_store %arg9[%c2_56, %c0_57, %c0_58], %98 {strides = array<i32>} : memref<4x8x1xf32, #tpu.memory_space<vmem>>, vector<1x8x1xf32>,
    %c2_59 = arith.constant 2 : index
    %c0_60 = arith.constant 0 : index
    %c0_61 = arith.constant 0 : index
    %99 = vector.load %arg10[%c2_59, %c0_60, %c0_61] : memref<4x8x8xf32, #tpu.memory_space<vmem>>, vector<1x8x8xf32>
    %100 = vector.shape_cast %99 : vector<1x8x8xf32> to vector<8x8xf32>
    %101 = vector.broadcast %88 : vector<8x1xf32> to vector<8x8xf32>
    %102 = arith.mulf %101, %100 : vector<8x8xf32>
    %cst_62 = arith.constant dense<0.000000e+00> : vector<8x8xf32>
    %103 = tpu.matmul %91, %78, %cst_62 {dimension_numbers = #tpu.dot_dimension_numbers<[1], [0], [0], [1], [0, 0, 1, 1], [], []>} : vector<8x8xf32>, vector<8x8xf32>, vector<8x8xf32> -> vector<8x8xf32>
    %104 = arith.addf %102, %103 : vector<8x8xf32>
    %c2_63 = arith.constant 2 : index
    %c0_64 = arith.constant 0 : index
    %c0_65 = arith.constant 0 : index
    %105 = vector.load %arg10[%c2_63, %c0_64, %c0_65] : memref<4x8x8xf32, #tpu.memory_space<vmem>>, vector<1x8x8xf32>
    %106 = vector.shape_cast %105 : vector<1x8x8xf32> to vector<8x8xf32>
    %107 = vector.shape_cast %104 : vector<8x8xf32> to vector<1x8x8xf32>
    tpu.vector_store %arg10[%c2_63, %c0_64, %c0_65], %107 {strides = array<i32>} : memref<4x8x8xf32, #tpu.memory_space<vmem>>, vector<1x8x8xf32>,
    %c2_66 = arith.constant 2 : index
    %c0_67 = arith.constant 0 : index
    %c0_68 = arith.constant 0 : index
    %108 = vector.load %arg8[%c2_66, %c0_67, %c0_68] : memref<4x8x1xf32, #tpu.memory_space<vmem>>, vector<1x8x1xf32>
    %109 = vector.shape_cast %108 : vector<1x8x1xf32> to vector<8x1xf32>
    %110 = vector.shape_cast %86 : vector<8x1xf32> to vector<1x8x1xf32>
    tpu.vector_store %arg8[%c2_66, %c0_67, %c0_68], %110 {strides = array<i32>} : memref<4x8x1xf32, #tpu.memory_space<vmem>>, vector<1x8x1xf32>,
    %111 = vector.extract_strided_slice %3 {offsets = [0, 24], sizes = [8, 8], strides = [1, 1]} : vector<8x32xf32> to vector<8x8xf32>
    %112 = vector.extract_strided_slice %4 {offsets = [0, 24], sizes = [8, 8], strides = [1, 1]} : vector<8x32xf32> to vector<8x8xf32>
    %113 = vector.extract_strided_slice %5 {offsets = [0, 24], sizes = [8, 8], strides = [1, 1]} : vector<8x32xf32> to vector<8x8xf32>
    %cst_69 = arith.constant dense<0.000000e+00> : vector<8x8xf32>
    %114 = tpu.matmul %111, %112, %cst_69 {dimension_numbers = #tpu.dot_dimension_numbers<[1], [1], [0], [0], [0, 0, 1, 0], [], []>} : vector<8x8xf32>, vector<8x8xf32>, vector<8x8xf32> -> vector<8x8xf32>
    %c3 = arith.constant 3 : index
    %c0_70 = arith.constant 0 : index
    %c0_71 = arith.constant 0 : index
    %115 = vector.load %arg8[%c3, %c0_70, %c0_71] : memref<4x8x1xf32, #tpu.memory_space<vmem>>, vector<1x8x1xf32>
    %116 = vector.shape_cast %115 : vector<1x8x1xf32> to vector<8x1xf32>
    %c3_72 = arith.constant 3 : index
    %c0_73 = arith.constant 0 : index
    %c0_74 = arith.constant 0 : index
    %117 = vector.load %arg9[%c3_72, %c0_73, %c0_74] : memref<4x8x1xf32, #tpu.memory_space<vmem>>, vector<1x8x1xf32>
    %118 = vector.shape_cast %117 : vector<1x8x1xf32> to vector<8x1xf32>
    %cst_75 = arith.constant dense<0xFF800000> : vector<8xf32>
    %119 = vector.multi_reduction <maximumf>, %114, %cst_75 [1] : vector<8x8xf32> to vector<8xf32>
    %120 = vector.shape_cast %119 : vector<8xf32> to vector<8x1xf32>
    %121 = arith.maximumf %116, %120 : vector<8x1xf32>
    %122 = arith.subf %116, %121 : vector<8x1xf32>
    %123 = math.exp %122 : vector<8x1xf32>
    %124 = vector.broadcast %121 : vector<8x1xf32> to vector<8x8xf32>
    %125 = arith.subf %114, %124 : vector<8x8xf32>
    %126 = math.exp %125 : vector<8x8xf32>
    %127 = arith.mulf %123, %118 : vector<8x1xf32>
    %cst_76 = arith.constant dense<0.000000e+00> : vector<8xf32>
    %128 = vector.multi_reduction <add>, %126, %cst_76 [1] : vector<8x8xf32> to vector<8xf32>
    %129 = vector.shape_cast %128 : vector<8xf32> to vector<8x1xf32>
    %130 = arith.addf %127, %129 : vector<8x1xf32>
    %c3_77 = arith.constant 3 : index
    %c0_78 = arith.constant 0 : index
    %c0_79 = arith.constant 0 : index
    %131 = vector.load %arg9[%c3_77, %c0_78, %c0_79] : memref<4x8x1xf32, #tpu.memory_space<vmem>>, vector<1x8x1xf32>
    %132 = vector.shape_cast %131 : vector<1x8x1xf32> to vector<8x1xf32>
    %133 = vector.shape_cast %130 : vector<8x1xf32> to vector<1x8x1xf32>
    tpu.vector_store %arg9[%c3_77, %c0_78, %c0_79], %133 {strides = array<i32>} : memref<4x8x1xf32, #tpu.memory_space<vmem>>, vector<1x8x1xf32>,
    %c3_80 = arith.constant 3 : index
    %c0_81 = arith.constant 0 : index
    %c0_82 = arith.constant 0 : index
    %134 = vector.load %arg10[%c3_80, %c0_81, %c0_82] : memref<4x8x8xf32, #tpu.memory_space<vmem>>, vector<1x8x8xf32>
    %135 = vector.shape_cast %134 : vector<1x8x8xf32> to vector<8x8xf32>
    %136 = vector.broadcast %123 : vector<8x1xf32> to vector<8x8xf32>
    %137 = arith.mulf %136, %135 : vector<8x8xf32>
    %cst_83 = arith.constant dense<0.000000e+00> : vector<8x8xf32>
    %138 = tpu.matmul %126, %113, %cst_83 {dimension_numbers = #tpu.dot_dimension_numbers<[1], [0], [0], [1], [0, 0, 1, 1], [], []>} : vector<8x8xf32>, vector<8x8xf32>, vector<8x8xf32> -> vector<8x8xf32>
    %139 = arith.addf %137, %138 : vector<8x8xf32>
    %c3_84 = arith.constant 3 : index
    %c0_85 = arith.constant 0 : index
    %c0_86 = arith.constant 0 : index
    %140 = vector.load %arg10[%c3_84, %c0_85, %c0_86] : memref<4x8x8xf32, #tpu.memory_space<vmem>>, vector<1x8x8xf32>
    %141 = vector.shape_cast %140 : vector<1x8x8xf32> to vector<8x8xf32>
    %142 = vector.shape_cast %139 : vector<8x8xf32> to vector<1x8x8xf32>
    tpu.vector_store %arg10[%c3_84, %c0_85, %c0_86], %142 {strides = array<i32>} : memref<4x8x8xf32, #tpu.memory_space<vmem>>, vector<1x8x8xf32>,
    %c3_87 = arith.constant 3 : index
    %c0_88 = arith.constant 0 : index
    %c0_89 = arith.constant 0 : index
    %143 = vector.load %arg8[%c3_87, %c0_88, %c0_89] : memref<4x8x1xf32, #tpu.memory_space<vmem>>, vector<1x8x1xf32>
    %144 = vector.shape_cast %143 : vector<1x8x1xf32> to vector<8x1xf32>
    %145 = vector.shape_cast %121 : vector<8x1xf32> to vector<1x8x1xf32>
    tpu.vector_store %arg8[%c3_87, %c0_88, %c0_89], %145 {strides = array<i32>} : memref<4x8x1xf32, #tpu.memory_space<vmem>>, vector<1x8x1xf32>,
    %c0_i32_90 = arith.constant 0 : i32
    %146 = arith.cmpi eq, %arg1, %c0_i32_90 : i32
    %147 = arith.extui %146 : i1 to i32
    %c0_i32_91 = arith.constant 0 : i32
    %148 = arith.cmpi ne, %147, %c0_i32_91 : i32
    scf.if %148 {
      %c0_92 = arith.constant 0 : index
      %c0_93 = arith.constant 0 : index
      %149 = vector.load %arg5[%c0_92, %c0_93] : memref<32x32xf32, #tpu.memory_space<vmem>>, vector<32x32xf32>
      %c0_94 = arith.constant 0 : index
      %c0_95 = arith.constant 0 : index
      %150 = vector.load %arg6[%c0_94, %c0_95] : memref<1x32xf32, #tpu.memory_space<vmem>>, vector<1x32xf32>
      %c0_96 = arith.constant 0 : index
      %c0_97 = arith.constant 0 : index
      %c0_98 = arith.constant 0 : index
      %151 = vector.load %arg10[%c0_96, %c0_97, %c0_98] : memref<4x8x8xf32, #tpu.memory_space<vmem>>, vector<1x8x8xf32>
      %152 = vector.shape_cast %151 : vector<1x8x8xf32> to vector<8x8xf32>
      %c0_99 = arith.constant 0 : index
      %c0_100 = arith.constant 0 : index
      %c0_101 = arith.constant 0 : index
      %153 = vector.load %arg9[%c0_99, %c0_100, %c0_101] : memref<4x8x1xf32, #tpu.memory_space<vmem>>, vector<1x8x1xf32>
      %154 = vector.shape_cast %153 : vector<1x8x1xf32> to vector<8x1xf32>
      %155 = tpu.reciprocal %154 {approx = true} : vector<8x1xf32> -> vector<8x1xf32>
      %156 = vector.broadcast %155 : vector<8x1xf32> to vector<8x8xf32>
      %157 = arith.mulf %152, %156 : vector<8x8xf32>
      %158 = vector.extract_strided_slice %149 {offsets = [0, 0], sizes = [8, 32], strides = [1, 1]} : vector<32x32xf32> to vector<8x32xf32>
      %cst_102 = arith.constant dense<0.000000e+00> : vector<8x32xf32>
      %159 = tpu.matmul %157, %158, %cst_102 {dimension_numbers = #tpu.dot_dimension_numbers<[1], [0], [0], [1], [0, 0, 1, 1], [], []>} : vector<8x8xf32>, vector<8x32xf32>, vector<8x32xf32> -> vector<8x32xf32>
      %160 = vector.broadcast %150 : vector<1x32xf32> to vector<8x32xf32>
      %161 = arith.addf %160, %159 : vector<8x32xf32>
      %c1_103 = arith.constant 1 : index
      %c0_104 = arith.constant 0 : index
      %c0_105 = arith.constant 0 : index
      %162 = vector.load %arg10[%c1_103, %c0_104, %c0_105] : memref<4x8x8xf32, #tpu.memory_space<vmem>>, vector<1x8x8xf32>
      %163 = vector.shape_cast %162 : vector<1x8x8xf32> to vector<8x8xf32>
      %c1_106 = arith.constant 1 : index
      %c0_107 = arith.constant 0 : index
      %c0_108 = arith.constant 0 : index
      %164 = vector.load %arg9[%c1_106, %c0_107, %c0_108] : memref<4x8x1xf32, #tpu.memory_space<vmem>>, vector<1x8x1xf32>
      %165 = vector.shape_cast %164 : vector<1x8x1xf32> to vector<8x1xf32>
      %166 = tpu.reciprocal %165 {approx = true} : vector<8x1xf32> -> vector<8x1xf32>
      %167 = vector.broadcast %166 : vector<8x1xf32> to vector<8x8xf32>
      %168 = arith.mulf %163, %167 : vector<8x8xf32>
      %169 = vector.extract_strided_slice %149 {offsets = [8, 0], sizes = [8, 32], strides = [1, 1]} : vector<32x32xf32> to vector<8x32xf32>
      %cst_109 = arith.constant dense<0.000000e+00> : vector<8x32xf32>
      %170 = tpu.matmul %168, %169, %cst_109 {dimension_numbers = #tpu.dot_dimension_numbers<[1], [0], [0], [1], [0, 0, 1, 1], [], []>} : vector<8x8xf32>, vector<8x32xf32>, vector<8x32xf32> -> vector<8x32xf32>
      %171 = arith.addf %161, %170 : vector<8x32xf32>
      %c2_110 = arith.constant 2 : index
      %c0_111 = arith.constant 0 : index
      %c0_112 = arith.constant 0 : index
      %172 = vector.load %arg10[%c2_110, %c0_111, %c0_112] : memref<4x8x8xf32, #tpu.memory_space<vmem>>, vector<1x8x8xf32>
      %173 = vector.shape_cast %172 : vector<1x8x8xf32> to vector<8x8xf32>
      %c2_113 = arith.constant 2 : index
      %c0_114 = arith.constant 0 : index
      %c0_115 = arith.constant 0 : index
      %174 = vector.load %arg9[%c2_113, %c0_114, %c0_115] : memref<4x8x1xf32, #tpu.memory_space<vmem>>, vector<1x8x1xf32>
      %175 = vector.shape_cast %174 : vector<1x8x1xf32> to vector<8x1xf32>
      %176 = tpu.reciprocal %175 {approx = true} : vector<8x1xf32> -> vector<8x1xf32>
      %177 = vector.broadcast %176 : vector<8x1xf32> to vector<8x8xf32>
      %178 = arith.mulf %173, %177 : vector<8x8xf32>
      %179 = vector.extract_strided_slice %149 {offsets = [16, 0], sizes = [8, 32], strides = [1, 1]} : vector<32x32xf32> to vector<8x32xf32>
      %cst_116 = arith.constant dense<0.000000e+00> : vector<8x32xf32>
      %180 = tpu.matmul %178, %179, %cst_116 {dimension_numbers = #tpu.dot_dimension_numbers<[1], [0], [0], [1], [0, 0, 1, 1], [], []>} : vector<8x8xf32>, vector<8x32xf32>, vector<8x32xf32> -> vector<8x32xf32>
      %181 = arith.addf %171, %180 : vector<8x32xf32>
      %c3_117 = arith.constant 3 : index
      %c0_118 = arith.constant 0 : index
      %c0_119 = arith.constant 0 : index
      %182 = vector.load %arg10[%c3_117, %c0_118, %c0_119] : memref<4x8x8xf32, #tpu.memory_space<vmem>>, vector<1x8x8xf32>
      %183 = vector.shape_cast %182 : vector<1x8x8xf32> to vector<8x8xf32>
      %c3_120 = arith.constant 3 : index
      %c0_121 = arith.constant 0 : index
      %c0_122 = arith.constant 0 : index
      %184 = vector.load %arg9[%c3_120, %c0_121, %c0_122] : memref<4x8x1xf32, #tpu.memory_space<vmem>>, vector<1x8x1xf32>
      %185 = vector.shape_cast %184 : vector<1x8x1xf32> to vector<8x1xf32>
      %186 = tpu.reciprocal %185 {approx = true} : vector<8x1xf32> -> vector<8x1xf32>
      %187 = vector.broadcast %186 : vector<8x1xf32> to vector<8x8xf32>
      %188 = arith.mulf %183, %187 : vector<8x8xf32>
      %189 = vector.extract_strided_slice %149 {offsets = [24, 0], sizes = [8, 32], strides = [1, 1]} : vector<32x32xf32> to vector<8x32xf32>
      %cst_123 = arith.constant dense<0.000000e+00> : vector<8x32xf32>
      %190 = tpu.matmul %188, %189, %cst_123 {dimension_numbers = #tpu.dot_dimension_numbers<[1], [0], [0], [1], [0, 0, 1, 1], [], []>} : vector<8x8xf32>, vector<8x32xf32>, vector<8x32xf32> -> vector<8x32xf32>
      %191 = arith.addf %181, %190 : vector<8x32xf32>
      %c0_124 = arith.constant 0 : index
      %c0_125 = arith.constant 0 : index
      %192 = vector.load %arg7[%c0_124, %c0_125] : memref<8x32xf32, #tpu.memory_space<vmem>>, vector<8x32xf32>
      tpu.vector_store %arg7[%c0_124, %c0_125], %191 {strides = array<i32>} : memref<8x32xf32, #tpu.memory_space<vmem>>, vector<8x32xf32>,
    } else {
    }
    return
  }
  func.func @transform_0(%arg0: i32, %arg1: i32) -> (i32, i32) {
    %c0_i32 = arith.constant 0 : i32
    %c0_i32_0 = arith.constant 0 : i32
    return %arg0, %c0_i32 : i32, i32
  }
  func.func @transform_1(%arg0: i32, %arg1: i32) -> (i32, i32) {
    %c0_i32 = arith.constant 0 : i32
    %c0_i32_0 = arith.constant 0 : i32
    return %arg1, %c0_i32 : i32, i32
  }
  func.func @transform_2(%arg0: i32, %arg1: i32) -> (i32, i32) {
    %c0_i32 = arith.constant 0 : i32
    %c0_i32_0 = arith.constant 0 : i32
    return %arg1, %c0_i32 : i32, i32
  }
  func.func @transform_3(%arg0: i32, %arg1: i32) -> (i32, i32) {
    %c0_i32 = arith.constant 0 : i32
    %c0_i32_0 = arith.constant 0 : i32
    %c0_i32_1 = arith.constant 0 : i32
    return %c0_i32, %c0_i32_0 : i32, i32
  }
  func.func @transform_4(%arg0: i32, %arg1: i32) -> (i32, i32) {
    %c0_i32 = arith.constant 0 : i32
    %c0_i32_0 = arith.constant 0 : i32
    %c0_i32_1 = arith.constant 0 : i32
    return %c0_i32, %c0_i32_0 : i32, i32
  }
  func.func @transform_5(%arg0: i32, %arg1: i32) -> (i32, i32) {
    %c0_i32 = arith.constant 0 : i32
    %c0_i32_0 = arith.constant 0 : i32
    return %arg0, %c0_i32 : i32, i32
  }
}

</mosaic_0001>

<bundles_post_ra>
// kernel: self_attention_layer.2
= control target key start
LH: loop header
LB: loop body
LE: loop exit
PB: predicated region body
PF: predicated region fallthrough
CT: control target
= control target key end

     0   :  { %11 = vsyncpa [#allocation3], 0  ;;  %s257_s0 = inlined_call_operand.hbm [shape: f32[8,32], index: 0, kind: input, shape index: {}]   ;;  %s258_s1 = inlined_call_operand.hbm [shape: f32[32,96], index: 1, kind: input, shape index: {}]   ;;  %s259_s2 = inlined_call_operand.hbm [shape: f32[1,96], index: 2, kind: input, shape index: {}]   ;;  %s260_s3 = inlined_call_operand.vmem [shape: f32[8,32], index: 3, kind: output, shape index: {0}]   ;;  %s261_s4 = inlined_call_operand.vmem [shape: f32[8,32], index: 4, kind: output, shape index: {1}]   ;;  %s262_s5 = inlined_call_operand.vmem [shape: f32[8,32], index: 5, kind: output, shape index: {2}]  }
   0x1   :  { %12 = vsyncpa [#allocation5], 0  ;;  %s28_s20 = sshll.u32 %s258_s1, 4  ;;  %s202_s21 = smov [#allocation4]   ;;  %s29_s20 = int_to_ptr.hbm [resolvable:$true] %s28_s20 }
   0x2   :  { %s30_s22 = sshll.u32 %s202_s21, 4  ;;  %s18_s25 = sshll.u32 %s257_s0, 4  ;;  %s31_s22 = int_to_ptr.vmem [resolvable:$true] %s30_s22  ;;  %s19_s25 = int_to_ptr.hbm [resolvable:$true] %s18_s25 }
   0x3   :  { %s203_s26 = smov 128   ;;  %s204_s27 = smov 8  }
   0x4   :  { %36 = dma.hbm_to_vmem [thread:$0]  %s29_s20, 512, %s31_s22, [#allocation5], %s203_s26, %s203_s26, %s204_s27  }
   0x5   :  { %s205_s28 = smov [#allocation2]   ;;  %s42_s7 = sshll.u32 %s259_s2, 4  ;;  %s43_s7 = int_to_ptr.hbm [resolvable:$true] %s42_s7 }
   0x6   :  { %s20_s29 = sshll.u32 %s205_s28, 4  ;;  %s206_s1 = smov [#allocation6]   ;;  %s21_s29 = int_to_ptr.vmem [resolvable:$true] %s20_s29 }
   0x7   :  { %23 = dma.hbm_to_vmem [thread:$0]  %s19_s25, 128, %s21_s29, [#allocation3]  }
   0x8   :  { %s44_s8 = sshll.u32 %s206_s1, 4  ;;  %s45_s8 = int_to_ptr.vmem [resolvable:$true] %s44_s8 }
   0x9   :  { %47 = dma.hbm_to_vmem [thread:$0]  %s43_s7, 16, %s45_s8, [#allocation5]  }
   0xa   :  { %198 = dma.done.wait [#allocation3], 128  }
   0xb   :  { %199 = vsyncadd [#allocation3], 4294967168 }
   0xc   :  { %200 = dma.done.wait [#allocation5], 528  }
   0xd   :  { %201 = vsyncadd [#allocation5], 4294966768  ;;  %v64_v0 = vld [vmem:[#allocation4 + $0x18] sm:$0xff]  ;;  %v63_v1 = vld [vmem:[#allocation4 + $0x10] sm:$0xff]  ;;  %vm69_vm0 = vcmask 261120   ;;  %s207_s9 = smov 96  }
   0xe   :  { %85 = vmatpush.msra.mxu0 %v64_v0  ;;  %v62_v2 = vld [vmem:[#allocation4 + $0x8] sm:$0xff]  ;;  %v61_v3 = vld [vmem:[#allocation4] sm:$0xff]  ;;  %v60_v4 = vld [vmem:[#allocation2] sm:$0xff]  ;;  %s208_s10 = smov 64  }
   0xf   :  { %v125_v5 = vld [vmem:[#allocation6] ss:$0 sm:$0xff] }
  0x10   :  { %86 = vmatpush.msra.mxu0 %v63_v1 }
  0x12   :  { %87 = vmatpush.msra.mxu0 %v62_v2 }
  0x14   :  { %88 = vmatpush.msra.mxu0 %v61_v3 }
  0x15   :  { %117 = vmatmul.msk.f32.vlgmr.msra.gmra.mxu0 %vm69_vm0, %v60_v4 }
  0x92   :  { %v90_v6 = vpop.f32.mrf.mxu0 }
  0x93   :  { %v91_v7 = vadd.f32 %v125_v5, %v90_v6 }
  0x95   :  { %93 = vst.msk [vmem:[%s260_s3] sm:$0xff] %vm69_vm0, %v91_v7  ;;  %95 = vrot.lane.b32.xlu0 %v91_v7, %s207_s9 }
  0x9d   :  { %99 = vrot.lane.b32.xlu0 %v91_v7, %s208_s10 }
 0x107   :  { %v96_v8 = vpop.permute.xlu0 %95 }
 0x108   :  { %98 = vst.msk [vmem:[%s261_s4] sm:$0xff] %vm69_vm0, %v96_v8 }
 0x10f   :  { %v100_v9 = vpop.permute.xlu0 %99 }
 0x110   :  { %102 = vst.msk [vmem:[%s262_s5] sm:$0xff] %vm69_vm0, %v100_v9 }
 0x111   :  { %115 = vsyncpa [#allocation3], 1 }
 0x112   :  { %116 = vsyncpa [#allocation5], 1 }

// kernel: self_attention_layer.3
= control target key start
LH: loop header
LB: loop body
LE: loop exit
PB: predicated region body
PF: predicated region fallthrough
CT: control target
= control target key end

     0   :  { %10 = vsyncpa [#allocation6], 0  ;;  %s817_s0 = inlined_call_operand.vmem [shape: f32[8,32], index: 0, kind: input, shape index: {}]   ;;  %s818_s1 = inlined_call_operand.vmem [shape: f32[8,32], index: 1, kind: input, shape index: {}]   ;;  %s819_s2 = inlined_call_operand.vmem [shape: f32[8,32], index: 2, kind: input, shape index: {}]   ;;  %s820_s3 = inlined_call_operand.hbm [shape: f32[32,32], index: 3, kind: input, shape index: {}]   ;;  %s821_s4 = inlined_call_operand.vmem [shape: f32[1,32], index: 4, kind: input, shape index: {}]   ;;  %s822_s5 = inlined_call_operand.hbm [shape: f32[8,32], index: 5, kind: output, shape index: {}]  }
   0x1   :  { %11 = vsyncpa [#allocation7], 0  ;;  %s22_s20 = sshll.u32 %s820_s3, 4  ;;  %s681_s21 = smov [#allocation5]   ;;  %s23_s20 = int_to_ptr.hbm [resolvable:$true] %s22_s20 }
   0x2   :  { %s24_s22 = sshll.u32 %s681_s21, 4  ;;  %s682_s23 = smov 128   ;;  %s25_s22 = int_to_ptr.vmem [resolvable:$true] %s24_s22 }
   0x3   :  { %s683_s24 = smov 8  }
   0x4   :  { %30 = dma.hbm_to_vmem [thread:$0]  %s23_s20, 512, %s25_s22, [#allocation6], %s682_s23, %s682_s23, %s683_s24  }
   0x5   :  { %677 = dma.done.wait [#allocation6], 512  }
   0x6   :  { %678 = vsyncadd [#allocation6], 4294966784  ;;  %vm50_vm0 = vcmask 64512   ;;  %v56_v0 = vld [vmem:[%s818_s1] sm:$0xff]  ;;  %s684_s27 = smov 120   ;;  %s685_s29 = smov 104  }
   0x7   :  { %144 = vrot.lane.b32.xlu1 %v56_v0, %s684_s27  ;;  %575 = vmatpush.xpose.msk.msra.mxu0 %vm50_vm0, %v56_v0  ;;  %v55_v1 = vld [vmem:[%s817_s0] sm:$0xff]  ;;  %s686_s30 = smov 112   ;;  %vm41_vm1 = vcmask 7168   ;;  %v687_v3 = vmov -inf   ;;  %v688_v9 = vmov 0   ;;  %v689_v10 = vmov 0.0  }
   0x8   :  { %325 = vrot.lane.b32.xlu2 %v56_v0, %s685_s29  ;;  %42 = vst.msk [vmem:[#allocation2] sm:$0xff] %vm41_vm1, %v687_v3  ;;  %601 = vset.pattern.permute.xlu0 %v688_v9  ;;  %v770_v19 = vld [vmem:[%s819_s2] sm:$0xff]  ;;  %s690_s7 = smov [#allocation8]   ;;  %s565_s11 = sshll.u32 %s822_s5, 4  ;;  %vm556_vm2 = vcmask 261120   ;;  %s566_s11 = int_to_ptr.hbm [resolvable:$true] %s565_s11 }
   0x9   :  { %43 = vst.msk [vmem:[#allocation2 + $0x8] sm:$0xff] %vm41_vm1, %v687_v3  ;;  %602 = vset.pattern.permute.xlu2 %v688_v9  ;;  %603 = vset.pattern.permute.xlu1 %v688_v9  ;;  %s563_s8 = sshll.u32 %s690_s7, 4  ;;  %s564_s8 = int_to_ptr.vmem [resolvable:$true] %s563_s8 }
   0xa   :  { %576 = vmatmul.msk.f32.vlgmr.msra.gmra.mxu0 %vm50_vm0, %v55_v1  ;;  %44 = vst.msk [vmem:[#allocation2 + $0x10] sm:$0xff] %vm41_vm1, %v687_v3  ;;  %134 = vmatpush.msra.mxu1 %v770_v19 }
   0xb   :  { %45 = vst.msk [vmem:[#allocation2 + $0x18] sm:$0xff] %vm41_vm1, %v687_v3 }
   0xc   :  { %47 = vst.msk [vmem:[#allocation3 + $0x8] sm:$0xff] %vm41_vm1, %v689_v10 }
   0xd   :  { %46 = vst.msk [vmem:[#allocation3] sm:$0xff] %vm41_vm1, %v689_v10 }
   0xe   :  { %48 = vst.msk [vmem:[#allocation3 + $0x10] sm:$0xff] %vm41_vm1, %v689_v10 }
   0xf   :  { %142 = vrot.lane.b32.xlu1 %v55_v1, %s684_s27  ;;  %49 = vst.msk [vmem:[#allocation3 + $0x18] sm:$0xff] %vm41_vm1, %v689_v10  ;;  %v756_v13 = vld [vmem:[#allocation2] sm:$0xff] }
  0x10   :  { %323 = vrot.lane.b32.xlu2 %v55_v1, %s685_s29  ;;  %51 = vst.msk [vmem:[#allocation4] sm:$0xff] %vm50_vm0, %v689_v10  ;;  %v171_v29 = vld [vmem:[#allocation2 + $0x8] sm:$0xff] }
  0x11   :  { %52 = vst.msk [vmem:[#allocation4 + $0x8] sm:$0xff] %vm50_vm0, %v689_v10  ;;  %v262_v58 = vld [vmem:[#allocation2 + $0x10] sm:$0xff] }
  0x12   :  { %53 = vst.msk [vmem:[#allocation4 + $0x10] sm:$0xff] %vm50_vm0, %v689_v10  ;;  %v352_v22 = vld [vmem:[#allocation2 + $0x18] sm:$0xff] }
  0x13   :  { %54 = vst.msk [vmem:[#allocation4 + $0x18] sm:$0xff] %vm50_vm0, %v689_v10  ;;  %v173_v51 = vld [vmem:[#allocation3 + $0x8] sm:$0xff] }
  0x17   :  { %235 = vrot.lane.b32.xlu1 %v56_v0, %s686_s30  ;;  %v354_v0 = vld [vmem:[#allocation3 + $0x18] sm:$0xff] }
  0x18   :  { %233 = vrot.lane.b32.xlu2 %v55_v1, %s686_s30 }
  0x62   :  { %v326_v2 = vpop.permute.xlu2 %325 }
  0x63   :  { %584 = vmatpush.xpose.msk.msrb.mxu0 %vm50_vm0, %v326_v2 }
  0x6a   :  { %v324_v4 = vpop.permute.xlu2 %323 }
  0x6b   :  { %585 = vmatmul.msk.f32.vlgmr.msrb.gmra.mxu0 %vm50_vm0, %v324_v4 }
  0x72   :  { %v234_v21 = vpop.permute.xlu2 %233 }
  0x79   :  { %v145_v5 = vpop.permute.xlu1 %144 }
  0x7a   :  { %578 = vmatpush.xpose.msk.msra.mxu2 %vm50_vm0, %v145_v5  ;;  %v377_v5 = vld [vmem:[#allocation4 + $0x18] sm:$0xff] }
  0x81   :  { %v143_v6 = vpop.permute.xlu1 %142 }
  0x82   :  { %579 = vmatmul.msk.f32.vlgmr.msra.gmra.mxu2 %vm50_vm0, %v143_v6 }
  0x87   :  { %v82_v7 = vpop.f32.mrf.mxu0 }
  0x88   :  { %v87_v8 = vsel %vm50_vm0, %v82_v7, -inf }
  0x89   :  { %88 = vmax.xlane.f32.xlu0 %v87_v8  ;;  %v236_v20 = vpop.permute.xlu1 %235 }
  0x8a   :  { %581 = vmatpush.xpose.msk.msrb.mxu1 %vm50_vm0, %v236_v20 }
  0xe8   :  { %v348_v11 = vpop.f32.mrf.mxu0 }
  0xe9   :  { %v355_v12 = vsel %vm50_vm0, %v348_v11, -inf }
  0xea   :  { %356 = vmax.xlane.f32.xlu2 %v355_v12 }
  0xfc   :  { %v89_v14 = vpop.xlane.xlu0 %88 }
  0xfd   :  { %v759_v15 = vmax.f32 %v756_v13, %v89_v14 }
  0xff   :  { %v91_v16 = vsub.f32 %v756_v13, %v759_v15  ;;  %141 = vst.msk [vmem:[#allocation2] sm:$0xff] %vm41_vm1, %v759_v15  ;;  %96 = vperm.xlu0 %601, %v759_v15  }
 0x105   :  { %v167_v17 = vpop.f32.mrf.mxu2 }
 0x106   :  { %v174_v18 = vsel %vm50_vm0, %v167_v17, -inf }
 0x107   :  { %175 = vmax.xlane.f32.xlu1 %v174_v18 }
 0x15d   :  { %v357_v23 = vpop.xlane.xlu2 %356 }
 0x15e   :  { %v358_v24 = vmax.f32 %v352_v22, %v357_v23 }
 0x160   :  { %v359_v25 = vsub.f32 %v352_v22, %v358_v24  ;;  %412 = vst.msk [vmem:[#allocation2 + $0x18] sm:$0xff] %vm41_vm1, %v358_v24  ;;  %364 = vperm.xlu1 %603, %v358_v24   ;;  %v92_v22 = vmul.f32 1.442695, %v91_v16  ;;  %v417_v24 = vld [vmem:[#allocation5 + $0x8] sm:$0xff] }
 0x162   :  { %v360_v49 = vmul.f32 1.442695, %v359_v25  ;;  %v419_v25 = vld [vmem:[#allocation5 + $0x18] sm:$0xff] }
 0x168   :  { %384 = vrot.lane.b32.xlu1 %v770_v19, %s685_s29 }
 0x171   :  { %v97_v26 = vpop.permute.xlu0 %96 }
 0x172   :  { %v99_v27 = vsub.f32 %v82_v7, %v97_v26  ;;  %v86_v26 = vld [vmem:[#allocation3] sm:$0xff] }
 0x174   :  { %v100_v28 = vmul.f32 1.442695, %v99_v27 }
 0x176   :  { %605 = vpow2.f32 %v100_v28 }
 0x17a   :  { %v176_v30 = vpop.xlane.xlu1 %175 }
 0x17b   :  { %v177_v31 = vmax.f32 %v171_v29, %v176_v30  ;;  %v196_v30 = vld [vmem:[#allocation4 + $0x8] sm:$0xff] }
 0x17c   :  { %v606_v32 = vpop.eup %605 }
 0x17d   :  { %v178_v33 = vsub.f32 %v171_v29, %v177_v31  ;;  %232 = vst.msk [vmem:[#allocation2 + $0x8] sm:$0xff] %vm41_vm1, %v177_v31  ;;  %183 = vperm.xlu2 %602, %v177_v31   ;;  %577 = vmatmul.msk.f32.vlgmr.msra.gmra.mxu1 %vm50_vm0, %v606_v32  ;;  %v103_v63 = vsel %vm50_vm0, %v606_v32, 0.0 }
 0x17f   :  { %v179_v48 = vmul.f32 1.442695, %v178_v33 }
 0x185   :  { %582 = vmatmul.msk.f32.vlgmr.msrb.gmra.mxu1 %vm50_vm0, %v234_v21 }
 0x1d2   :  { %v365_v37 = vpop.permute.xlu1 %364 }
 0x1d3   :  { %v367_v38 = vsub.f32 %v348_v11, %v365_v37 }
 0x1d5   :  { %v368_v39 = vmul.f32 1.442695, %v367_v38 }
 0x1d7   :  { %v184_v34 = vpop.permute.xlu2 %183 }
 0x1d8   :  { %v186_v35 = vsub.f32 %v167_v17, %v184_v34 }
 0x1da   :  { %v187_v36 = vmul.f32 1.442695, %v186_v35  ;;  %v385_v41 = vpop.permute.xlu1 %384 }
 0x1db   :  { %405 = vmatpush.msrb.mxu2 %v385_v41  ;;  %v264_v41 = vld [vmem:[#allocation3 + $0x10] sm:$0xff] }
 0x1dc   :  { %607 = vpow2.f32 %v187_v36 }
 0x1dd   :  { %609 = vpow2.f32 %v368_v39  ;;  %550 = vmatpush.msra.mxu2 %v419_v25 }
 0x1de   :  { %611 = vpow2.f32 %v179_v48 }
 0x1df   :  { %613 = vpow2.f32 %v360_v49 }
 0x1e2   :  { %v608_v40 = vpop.eup %607 }
 0x1e3   :  { %v190_v42 = vsel %vm50_vm0, %v608_v40, 0.0  ;;  %v610_v43 = vpop.eup %609 }
 0x1e4   :  { %191 = vadd.xlane.f32.xlu1 %v190_v42  ;;  %586 = vmatmul.msk.f32.vlgmr.msrb.gmra.mxu2 %vm50_vm0, %v610_v43  ;;  %v371_v47 = vsel %vm50_vm0, %v610_v43, 0.0  ;;  %v612_v50 = vpop.eup %611 }
 0x1e5   :  { %v614_v52 = vpop.eup %613  ;;  %v189_v53 = vmul.f32 %v612_v50, %v173_v51 }
 0x1e6   :  { %v370_v1 = vmul.f32 %v614_v52, %v354_v0 }
 0x1fa   :  { %v782_v44 = vpop.f32.mrf.mxu1 }
 0x202   :  { %v258_v45 = vpop.f32.mrf.mxu1 }
 0x203   :  { %v265_v46 = vsel %vm50_vm0, %v258_v45, -inf }
 0x204   :  { %266 = vmax.xlane.f32.xlu0 %v265_v46 }
 0x218   :  { %204 = vrot.lane.b32.xlu0 %v770_v19, %s684_s27 }
 0x242   :  { %372 = vadd.xlane.f32.xlu0 %v371_v47  ;;  %v287_v47 = vld [vmem:[#allocation4 + $0x10] sm:$0xff] }
 0x256   :  { %380 = vperm.xlu0 %601, %v614_v52   ;;  %v109_v52 = vld [vmem:[#allocation4] sm:$0xff] }
 0x257   :  { %v192_v54 = vpop.xlane.xlu1 %191 }
 0x258   :  { %v193_v55 = vadd.f32 %v192_v54, %v189_v53 }
 0x25a   :  { %194 = vst.msk [vmem:[#allocation3 + $0x8] sm:$0xff] %vm41_vm1, %v193_v55 }
 0x261   :  { %v458_v56 = vld [vmem:[#allocation3 + $0x8] sm:$0xff] }
 0x262   :  { %615 = vrcp.f32 %v458_v56  ;;  %v416_v56 = vld [vmem:[#allocation5] sm:$0xff] }
 0x263   :  { %448 = vmatpush.msra.mxu1 %v416_v56 }
 0x267   :  { %v407_v10 = vpop.f32.mrf.mxu2 }
 0x268   :  { %v616_v57 = vpop.eup %615 }
 0x269   :  { %462 = vperm.xlu0 %601, %v616_v57   ;;  %v418_v57 = vld [vmem:[#allocation5 + $0x10] sm:$0xff] }
 0x26a   :  { %517 = vmatpush.msra.mxu0 %v418_v57 }
 0x277   :  { %v267_v59 = vpop.xlane.xlu0 %266 }
 0x278   :  { %v268_v60 = vmax.f32 %v262_v58, %v267_v59 }
 0x27a   :  { %v269_v61 = vsub.f32 %v262_v58, %v268_v60  ;;  %322 = vst.msk [vmem:[#allocation2 + $0x10] sm:$0xff] %vm41_vm1, %v268_v60  ;;  %274 = vperm.xlu2 %602, %v268_v60  }
 0x27c   :  { %v270_v4 = vmul.f32 1.442695, %v269_v61 }
 0x27e   :  { %617 = vpow2.f32 %v270_v4 }
 0x282   :  { %294 = vrot.lane.b32.xlu2 %v770_v19, %s686_s30 }
 0x284   :  { %v618_v9 = vpop.eup %617 }
 0x285   :  { %v280_v42 = vmul.f32 %v618_v9, %v264_v41 }
 0x28a   :  { %v205_v62 = vpop.permute.xlu0 %204 }
 0x28b   :  { %225 = vmatpush.msra.mxu3 %v205_v62 }
 0x28c   :  { %580 = vmatmul.msk.f32.vlgmr.msra.gmra.mxu3 %vm50_vm0, %v608_v40 }
 0x2ab   :  { %104 = vadd.xlane.f32.xlu2 %v103_v63 }
 0x2b5   :  { %v373_v2 = vpop.xlane.xlu0 %372 }
 0x2b6   :  { %v374_v3 = vadd.f32 %v373_v2, %v370_v1 }
 0x2b8   :  { %375 = vst.msk [vmem:[#allocation3 + $0x18] sm:$0xff] %vm41_vm1, %v374_v3 }
 0x2bf   :  { %v524_v8 = vld [vmem:[#allocation3 + $0x18] sm:$0xff] }
 0x2c0   :  { %619 = vrcp.f32 %v524_v8 }
 0x2c3   :  { %199 = vperm.xlu2 %602, %v612_v50  }
 0x2c6   :  { %v620_v12 = vpop.eup %619 }
 0x2c8   :  { %v381_v6 = vpop.permute.xlu0 %380 }
 0x2c9   :  { %v383_v7 = vmul.f32 %v381_v6, %v377_v5 }
 0x2cb   :  { %v410_v11 = vadd.f32 %v407_v10, %v383_v7  ;;  %290 = vperm.xlu2 %602, %v618_v9  }
 0x2cd   :  { %411 = vst.msk [vmem:[#allocation4 + $0x18] sm:$0xff] %vm50_vm0, %v410_v11 }
 0x2d3   :  { %528 = vperm.xlu2 %602, %v620_v12  }
 0x2d4   :  { %v275_v14 = vpop.permute.xlu2 %274  ;;  %v523_v38 = vld [vmem:[#allocation4 + $0x18] sm:$0xff] }
 0x2d5   :  { %v277_v17 = vsub.f32 %v258_v45, %v275_v14 }
 0x2d7   :  { %v278_v18 = vmul.f32 1.442695, %v277_v17 }
 0x2d9   :  { %621 = vpow2.f32 %v278_v18 }
 0x2da   :  { %623 = vpow2.f32 %v92_v22 }
 0x2db   :  { %v463_v35 = vpop.permute.xlu0 %462 }
 0x2dc   :  { %v295_v19 = vpop.permute.xlu2 %294 }
 0x2dd   :  { %315 = vmatpush.msrb.mxu3 %v295_v19 }
 0x2df   :  { %v622_v20 = vpop.eup %621  ;;  %484 = vmatpush.msra.mxu3 %v417_v24 }
 0x2e0   :  { %583 = vmatmul.msk.f32.vlgmr.msrb.gmra.mxu3 %vm50_vm0, %v622_v20  ;;  %v281_v21 = vsel %vm50_vm0, %v622_v20, 0.0  ;;  %v624_v23 = vpop.eup %623 }
 0x2e1   :  { %282 = vadd.xlane.f32.xlu1 %v281_v21  ;;  %v102_v27 = vmul.f32 %v624_v23, %v86_v26 }
 0x2fa   :  { %112 = vperm.xlu1 %603, %v624_v23  }
 0x30f   :  { %v227_v33 = vpop.f32.mrf.mxu3 }
 0x31e   :  { %v105_v28 = vpop.xlane.xlu2 %104 }
 0x31f   :  { %v106_v29 = vadd.f32 %v105_v28, %v102_v27 }
 0x321   :  { %108 = vst.msk [vmem:[#allocation3] sm:$0xff] %vm41_vm1, %v106_v29 }
 0x326   :  { %v200_v31 = vpop.permute.xlu2 %199 }
 0x327   :  { %v202_v32 = vmul.f32 %v200_v31, %v196_v30 }
 0x328   :  { %v422_v34 = vld [vmem:[#allocation3] sm:$0xff] }
 0x329   :  { %v230_v13 = vadd.f32 %v227_v33, %v202_v32  ;;  %625 = vrcp.f32 %v422_v34 }
 0x32b   :  { %231 = vst.msk [vmem:[#allocation4 + $0x8] sm:$0xff] %vm50_vm0, %v230_v13 }
 0x32e   :  { %v291_v15 = vpop.permute.xlu2 %290 }
 0x32f   :  { %v626_v16 = vpop.eup %625  ;;  %v293_v48 = vmul.f32 %v291_v15, %v287_v47 }
 0x330   :  { %426 = vperm.xlu1 %603, %v626_v16  }
 0x332   :  { %v457_v36 = vld [vmem:[#allocation4 + $0x8] sm:$0xff] }
 0x333   :  { %v465_v37 = vmul.f32 %v463_v35, %v457_v36 }
 0x335   :  { %588 = vmatmul.msk.f32.vlgmr.msra.gmra.mxu3 %vm50_vm0, %v465_v37 }
 0x336   :  { %v529_v39 = vpop.permute.xlu2 %528 }
 0x337   :  { %v531_v40 = vmul.f32 %v529_v39, %v523_v38 }
 0x339   :  { %590 = vmatmul.msk.f32.vlgmr.msra.gmra.mxu2 %vm50_vm0, %v531_v40 }
 0x354   :  { %v283_v43 = vpop.xlane.xlu1 %282 }
 0x355   :  { %v284_v45 = vadd.f32 %v283_v43, %v280_v42 }
 0x357   :  { %285 = vst.msk [vmem:[#allocation3 + $0x10] sm:$0xff] %vm41_vm1, %v284_v45 }
 0x35e   :  { %v491_v46 = vld [vmem:[#allocation3 + $0x10] sm:$0xff] }
 0x35f   :  { %627 = vrcp.f32 %v491_v46 }
 0x363   :  { %v317_v49 = vpop.f32.mrf.mxu3 }
 0x364   :  { %v320_v50 = vadd.f32 %v317_v49, %v293_v48 }
 0x365   :  { %v628_v51 = vpop.eup %627 }
 0x366   :  { %321 = vst.msk [vmem:[#allocation4 + $0x10] sm:$0xff] %vm50_vm0, %v320_v50  ;;  %495 = vperm.xlu0 %601, %v628_v51  }
 0x36c   :  { %v113_v53 = vpop.permute.xlu1 %112 }
 0x36d   :  { %v115_v54 = vmul.f32 %v113_v53, %v109_v52  ;;  %v490_v62 = vld [vmem:[#allocation4 + $0x10] sm:$0xff] }
 0x36f   :  { %v139_v55 = vadd.f32 %v782_v44, %v115_v54  ;;  %v604_v44 = vld [vmem:[%s821_s4] ss:$0 sm:$0xff] }
 0x371   :  { %140 = vst.msk [vmem:[#allocation4] sm:$0xff] %vm50_vm0, %v139_v55 }
 0x378   :  { %v421_v58 = vld [vmem:[#allocation4] sm:$0xff] }
 0x3a2   :  { %v427_v59 = vpop.permute.xlu1 %426 }
 0x3a3   :  { %v429_v60 = vmul.f32 %v427_v59, %v421_v58 }
 0x3a5   :  { %587 = vmatmul.msk.f32.vlgmr.msra.gmra.mxu1 %vm50_vm0, %v429_v60 }
 0x3b8   :  { %v486_v2 = vpop.f32.mrf.mxu3 }
 0x3bc   :  { %v552_v6 = vpop.f32.mrf.mxu2 }
 0x3d8   :  { %v496_v61 = vpop.permute.xlu0 %495 }
 0x3d9   :  { %v498_v63 = vmul.f32 %v496_v61, %v490_v62 }
 0x3db   :  { %589 = vmatmul.msk.f32.vlgmr.msra.gmra.mxu0 %vm50_vm0, %v498_v63 }
 0x422   :  { %v450_v0 = vpop.f32.mrf.mxu1 }
 0x423   :  { %v456_v1 = vadd.f32 %v604_v44, %v450_v0 }
 0x425   :  { %v489_v3 = vadd.f32 %v486_v2, %v456_v1 }
 0x458   :  { %v519_v4 = vpop.f32.mrf.mxu0 }
 0x459   :  { %v522_v5 = vadd.f32 %v519_v4, %v489_v3 }
 0x45b   :  { %v555_v7 = vadd.f32 %v552_v6, %v522_v5 }
 0x45d   :  { %557 = vst.msk [vmem:[#allocation8] sm:$0xff] %vm556_vm2, %v555_v7 }
 0x45e   :  { %568 = dma.vmem_to_hbm [thread:$0]  %s564_s8, 128, %s566_s11, [#allocation7]  }
 0x45f   :  { %679 = dma.done.wait [#allocation7], 128  }
 0x460   :  { %680 = vsyncadd [#allocation7], 4294967168 }
 0x461   :  { %573 = vsyncpa [#allocation6], 1 }
 0x462   :  { %574 = vsyncpa [#allocation7], 1 }

</bundles_post_ra>
